<compile_context>
chip_gen: v5e
topology: v5e:2x2
jax: 0.10.0
libtpu: 0.0.40
codegen_flags: <defaults>
</compile_context>

<pallas_src>
import jax
import jax.numpy as jnp
from jax.experimental import pallas as pl
from jax.experimental.pallas import tpu as pltpu

LANES = 128
SUBLANES = 8


def _cdiv(a, b):
    return -(-a // b)


def _combined_loss_kernel(out0_ref, out1_ref, tgt_ref, part_ref, acc_sq, acc_abs):
    """Per-chunk accumulation of sum((o0-t)^2) and sum(|o1-t|) into (8,128) vector accs."""
    j = pl.program_id(1)

    @pl.when(j == 0)
    def _():
        acc_sq[...] = jnp.zeros_like(acc_sq)
        acc_abs[...] = jnp.zeros_like(acc_abs)

    t = tgt_ref[...].astype(jnp.float32)
    d0 = out0_ref[...].astype(jnp.float32) - t
    d1 = out1_ref[...].astype(jnp.float32) - t

    tr = d0.shape[0]
    g = tr // SUBLANES
    # Vreg-wise partial sums: (tr,128) -> (g,8,128), sum over leading axis = pure VPU adds.
    acc_sq[...] += (d0 * d0).reshape(g, SUBLANES, LANES).sum(axis=0)
    acc_abs[...] += jnp.abs(d1).reshape(g, SUBLANES, LANES).sum(axis=0)

    @pl.when(j == pl.num_programs(1) - 1)
    def _():
        part_ref[0, 0] = acc_sq[...]
        part_ref[0, 1] = acc_abs[...]


def combined_loss(outputs, targets, weights=(1.0, 0.5), tile_rows=1024, num_chunks=2):
    """outputs: list of two NCHW arrays, targets: NCHW array (same shape).

    tile_rows=1024 saturates HBM roofline on v5e/v6e/v7x while keeping the
    double-buffered footprint at ~3 MiB (well under the 16/32/32 MiB scoped
    VMEM defaults), so no vmem_limit_bytes override is required.
    """
    out0, out1 = outputs
    assert out0.shape == out1.shape == targets.shape
    n_elem = int(targets.size)

    o0 = out0.reshape(-1)
    o1 = out1.reshape(-1)
    tg = targets.reshape(-1)

    rows = _cdiv(n_elem, LANES)
    chunk_target = _cdiv(rows, num_chunks)
    # Tile row count: multiple of 8 (sublanes), capped at tile_rows.
    tr = min(tile_rows, max(SUBLANES, _cdiv(chunk_target, SUBLANES) * SUBLANES))
    steps = _cdiv(chunk_target, tr)
    chunk_rows = steps * tr
    rows_padded = chunk_rows * num_chunks
    n_padded = rows_padded * LANES

    if n_padded != n_elem:
        # Zero-pad all three streams: padded diffs are zero, so sums are unchanged;
        # the mean still divides by the true n_elem below.
        pad = n_padded - n_elem
        o0 = jnp.pad(o0, (0, pad))
        o1 = jnp.pad(o1, (0, pad))
        tg = jnp.pad(tg, (0, pad))

    o0 = o0.reshape(rows_padded, LANES)
    o1 = o1.reshape(rows_padded, LANES)
    tg = tg.reshape(rows_padded, LANES)

    tile_spec = pl.BlockSpec((tr, LANES), lambda i, j: (i * steps + j, 0))

    partials = pl.pallas_call(
        _combined_loss_kernel,
        out_shape=jax.ShapeDtypeStruct((num_chunks, 2, SUBLANES, LANES), jnp.float32),
        grid_spec=pltpu.PrefetchScalarGridSpec(
            num_scalar_prefetch=0,
            grid=(num_chunks, steps),
            in_specs=[tile_spec, tile_spec, tile_spec],
            out_specs=pl.BlockSpec((1, 2, SUBLANES, LANES), lambda i, j: (i, 0, 0, 0)),
            scratch_shapes=[pltpu.VMEM((SUBLANES, LANES), jnp.float32),
                            pltpu.VMEM((SUBLANES, LANES), jnp.float32)],
        ),
        compiler_params=pltpu.CompilerParams(
            # Leading chunk axis shards across TensorCores (v7x); trailing axis is the
            # sequential reduction carrying the VMEM accumulator.
            dimension_semantics=("parallel", "arbitrary")),
    )(o0, o1, tg)

    # Single cross-lane/sublane reduce, done once outside the hot loop.
    sums = jnp.sum(partials, axis=(0, 2, 3))  # (2,): [sum_sq, sum_abs]
    w = jnp.asarray(weights, dtype=jnp.float32)
    return jnp.sum(w * sums) / jnp.float32(n_elem)


def combined_loss_ref(outputs, targets, weights=(1.0, 0.5)):
    """Pure-JAX reference mirroring torch semantics."""
    t = targets.astype(jnp.float32)
    l0 = jnp.mean((outputs[0].astype(jnp.float32) - t) ** 2)    # MSELoss('mean')
    l1 = jnp.mean(jnp.abs(outputs[1].astype(jnp.float32) - t))  # L1Loss('mean')
    return jnp.sum(jnp.stack([weights[0] * l0, weights[1] * l1]))


if __name__ == "__main__":
    key = jax.random.PRNGKey(0)
    k0, k1, k2 = jax.random.split(key, 3)

    B, C, H, W = 2, 4, 16, 16            # NCHW, 2048 elements total
    out0 = jax.random.normal(k0, (B, C, H, W), dtype=jnp.float32)
    out1 = jax.random.normal(k1, (B, C, H, W), dtype=jnp.float32)
    targets = jax.random.normal(k2, (B, C, H, W), dtype=jnp.float32)

    loss = combined_loss([out0, out1], targets)
    loss = jax.block_until_ready(loss)

    ref = combined_loss_ref([out0, out1], targets)
    assert jnp.allclose(loss, ref, rtol=1e-5, atol=1e-5), (loss, ref)

    print("KERNEL_OK")
</pallas_src>

<mosaic_0001>
module attributes {stable_mosaic.version = 11 : i64} {
  func.func @_combined_loss_kernel(%arg0: i32, %arg1: i32, %arg2: memref<8x128xf32, #tpu.memory_space<vmem>>, %arg3: memref<8x128xf32, #tpu.memory_space<vmem>>, %arg4: memref<8x128xf32, #tpu.memory_space<vmem>>, %arg5: memref<1x2x8x128xf32, #tpu.memory_space<vmem>>, %arg6: memref<8x128xf32, #tpu.memory_space<vmem>>, %arg7: memref<8x128xf32, #tpu.memory_space<vmem>>) attributes {dimension_semantics = [#tpu.dimension_semantics<parallel>, #tpu.dimension_semantics<arbitrary>], iteration_bounds = array<i64: 2, 1>, scalar_prefetch = 0 : i64, scratch_operands = 2 : i64, tpu.core_type = #tpu.core_type<tc>, window_params = [{transform_indices = @transform_0, window_bounds = array<i64: 8, 128>}, {transform_indices = @transform_1, window_bounds = array<i64: 8, 128>}, {transform_indices = @transform_2, window_bounds = array<i64: 8, 128>}, {transform_indices = @transform_3, window_bounds = array<i64: 1, 2, 8, 128>}]} {
    %c0_i32 = arith.constant 0 : i32
    %0 = arith.cmpi eq, %arg1, %c0_i32 : i32
    %1 = arith.extui %0 : i1 to i32
    %c0_i32_0 = arith.constant 0 : i32
    %2 = arith.cmpi ne, %1, %c0_i32_0 : i32
    scf.if %2 {
      %cst_17 = arith.constant 0.000000e+00 : f32
      %23 = vector.broadcast %cst_17 : f32 to vector<8x128xf32>
      %c0_18 = arith.constant 0 : index
      %c0_19 = arith.constant 0 : index
      %24 = vector.load %arg6[%c0_18, %c0_19] : memref<8x128xf32, #tpu.memory_space<vmem>>, vector<8x128xf32>
      tpu.vector_store %arg6[%c0_18, %c0_19], %23 {strides = array<i32>} : memref<8x128xf32, #tpu.memory_space<vmem>>, vector<8x128xf32>,
      %cst_20 = arith.constant 0.000000e+00 : f32
      %25 = vector.broadcast %cst_20 : f32 to vector<8x128xf32>
      %c0_21 = arith.constant 0 : index
      %c0_22 = arith.constant 0 : index
      %26 = vector.load %arg7[%c0_21, %c0_22] : memref<8x128xf32, #tpu.memory_space<vmem>>, vector<8x128xf32>
      tpu.vector_store %arg7[%c0_21, %c0_22], %25 {strides = array<i32>} : memref<8x128xf32, #tpu.memory_space<vmem>>, vector<8x128xf32>,
    } else {
    }
    %c0 = arith.constant 0 : index
    %c0_1 = arith.constant 0 : index
    %3 = vector.load %arg4[%c0, %c0_1] : memref<8x128xf32, #tpu.memory_space<vmem>>, vector<8x128xf32>
    %c0_2 = arith.constant 0 : index
    %c0_3 = arith.constant 0 : index
    %4 = vector.load %arg2[%c0_2, %c0_3] : memref<8x128xf32, #tpu.memory_space<vmem>>, vector<8x128xf32>
    %5 = arith.subf %4, %3 : vector<8x128xf32>
    %c0_4 = arith.constant 0 : index
    %c0_5 = arith.constant 0 : index
    %6 = vector.load %arg3[%c0_4, %c0_5] : memref<8x128xf32, #tpu.memory_space<vmem>>, vector<8x128xf32>
    %7 = arith.subf %6, %3 : vector<8x128xf32>
    %c0_6 = arith.constant 0 : index
    %c0_7 = arith.constant 0 : index
    %8 = vector.load %arg6[%c0_6, %c0_7] : memref<8x128xf32, #tpu.memory_space<vmem>>, vector<8x128xf32>
    %9 = arith.mulf %5, %5 : vector<8x128xf32>
    %10 = vector.shape_cast %9 : vector<8x128xf32> to vector<1x8x128xf32>
    %cst = arith.constant dense<0.000000e+00> : vector<8x128xf32>
    %11 = vector.multi_reduction <add>, %10, %cst [0] : vector<1x8x128xf32> to vector<8x128xf32>
    %12 = arith.addf %8, %11 : vector<8x128xf32>
    %c0_8 = arith.constant 0 : index
    %c0_9 = arith.constant 0 : index
    %13 = vector.load %arg6[%c0_8, %c0_9] : memref<8x128xf32, #tpu.memory_space<vmem>>, vector<8x128xf32>
    tpu.vector_store %arg6[%c0_8, %c0_9], %12 {strides = array<i32>} : memref<8x128xf32, #tpu.memory_space<vmem>>, vector<8x128xf32>,
    %c0_10 = arith.constant 0 : index
    %c0_11 = arith.constant 0 : index
    %14 = vector.load %arg7[%c0_10, %c0_11] : memref<8x128xf32, #tpu.memory_space<vmem>>, vector<8x128xf32>
    %15 = math.absf %7 : vector<8x128xf32>
    %16 = vector.shape_cast %15 : vector<8x128xf32> to vector<1x8x128xf32>
    %cst_12 = arith.constant dense<0.000000e+00> : vector<8x128xf32>
    %17 = vector.multi_reduction <add>, %16, %cst_12 [0] : vector<1x8x128xf32> to vector<8x128xf32>
    %18 = arith.addf %14, %17 : vector<8x128xf32>
    %c0_13 = arith.constant 0 : index
    %c0_14 = arith.constant 0 : index
    %19 = vector.load %arg7[%c0_13, %c0_14] : memref<8x128xf32, #tpu.memory_space<vmem>>, vector<8x128xf32>
    tpu.vector_store %arg7[%c0_13, %c0_14], %18 {strides = array<i32>} : memref<8x128xf32, #tpu.memory_space<vmem>>, vector<8x128xf32>,
    %c0_i32_15 = arith.constant 0 : i32
    %20 = arith.cmpi eq, %arg1, %c0_i32_15 : i32
    %21 = arith.extui %20 : i1 to i32
    %c0_i32_16 = arith.constant 0 : i32
    %22 = arith.cmpi ne, %21, %c0_i32_16 : i32
    scf.if %22 {
      %c0_17 = arith.constant 0 : index
      %c0_18 = arith.constant 0 : index
      %23 = vector.load %arg6[%c0_17, %c0_18] : memref<8x128xf32, #tpu.memory_space<vmem>>, vector<8x128xf32>
      %c0_19 = arith.constant 0 : index
      %c0_20 = arith.constant 0 : index
      %c0_21 = arith.constant 0 : index
      %c0_22 = arith.constant 0 : index
      %24 = vector.load %arg5[%c0_19, %c0_20, %c0_21, %c0_22] : memref<1x2x8x128xf32, #tpu.memory_space<vmem>>, vector<1x1x8x128xf32>
      %25 = vector.shape_cast %24 : vector<1x1x8x128xf32> to vector<8x128xf32>
      %26 = vector.shape_cast %23 : vector<8x128xf32> to vector<1x1x8x128xf32>
      tpu.vector_store %arg5[%c0_19, %c0_20, %c0_21, %c0_22], %26 {strides = array<i32>} : memref<1x2x8x128xf32, #tpu.memory_space<vmem>>, vector<1x1x8x128xf32>,
      %c0_23 = arith.constant 0 : index
      %c0_24 = arith.constant 0 : index
      %27 = vector.load %arg7[%c0_23, %c0_24] : memref<8x128xf32, #tpu.memory_space<vmem>>, vector<8x128xf32>
      %c0_25 = arith.constant 0 : index
      %c1 = arith.constant 1 : index
      %c0_26 = arith.constant 0 : index
      %c0_27 = arith.constant 0 : index
      %28 = vector.load %arg5[%c0_25, %c1, %c0_26, %c0_27] : memref<1x2x8x128xf32, #tpu.memory_space<vmem>>, vector<1x1x8x128xf32>
      %29 = vector.shape_cast %28 : vector<1x1x8x128xf32> to vector<8x128xf32>
      %30 = vector.shape_cast %27 : vector<8x128xf32> to vector<1x1x8x128xf32>
      tpu.vector_store %arg5[%c0_25, %c1, %c0_26, %c0_27], %30 {strides = array<i32>} : memref<1x2x8x128xf32, #tpu.memory_space<vmem>>, vector<1x1x8x128xf32>,
    } else {
    }
    return
  }
  func.func @transform_0(%arg0: i32, %arg1: i32) -> (i32, i32) {
    %c1_i32 = arith.constant 1 : i32
    %0 = arith.muli %arg0, %c1_i32 : i32
    %1 = arith.addi %0, %arg1 : i32
    %c0_i32 = arith.constant 0 : i32
    %c0_i32_0 = arith.constant 0 : i32
    return %1, %c0_i32 : i32, i32
  }
  func.func @transform_1(%arg0: i32, %arg1: i32) -> (i32, i32) {
    %c1_i32 = arith.constant 1 : i32
    %0 = arith.muli %arg0, %c1_i32 : i32
    %1 = arith.addi %0, %arg1 : i32
    %c0_i32 = arith.constant 0 : i32
    %c0_i32_0 = arith.constant 0 : i32
    return %1, %c0_i32 : i32, i32
  }
  func.func @transform_2(%arg0: i32, %arg1: i32) -> (i32, i32) {
    %c1_i32 = arith.constant 1 : i32
    %0 = arith.muli %arg0, %c1_i32 : i32
    %1 = arith.addi %0, %arg1 : i32
    %c0_i32 = arith.constant 0 : i32
    %c0_i32_0 = arith.constant 0 : i32
    return %1, %c0_i32 : i32, i32
  }
  func.func @transform_3(%arg0: i32, %arg1: i32) -> (i32, i32, i32, i32) {
    %c0_i32 = arith.constant 0 : i32
    %c0_i32_0 = arith.constant 0 : i32
    %c0_i32_1 = arith.constant 0 : i32
    %c0_i32_2 = arith.constant 0 : i32
    return %arg0, %c0_i32, %c0_i32_0, %c0_i32_1 : i32, i32, i32, i32
  }
}

</mosaic_0001>

<bundles_post_ra>
// kernel: tpu_custom_call.1
= control target key start
LH: loop header
LB: loop body
LE: loop exit
PB: predicated region body
PF: predicated region fallthrough
CT: control target
= control target key end

     0   :  { %s908_s0 = inlined_call_operand.hbm [shape: f32[16,128], index: 0, kind: input, shape index: {}]   ;;  %s909_s1 = inlined_call_operand.hbm [shape: f32[16,128], index: 1, kind: input, shape index: {}]   ;;  %s910_s2 = inlined_call_operand.hbm [shape: f32[16,128], index: 2, kind: input, shape index: {}]   ;;  %s911_s3 = inlined_call_operand.hbm [shape: f32[2,2,8,128], index: 3, kind: output, shape index: {}]  }
   0x1   :  { %914 = sst [smem:[#allocation17_spill]] %s909_s1 }
   0x2   :  { %8 = vsyncpa [#allocation5], 0 }
   0x3   :  { %10 = vsyncpa [#allocation5 + $0x1], 0 }
   0x4   :  { %11 = vsyncpa [#allocation8], 0 }
   0x5   :  { %13 = vsyncpa [#allocation8 + $0x1], 0 }
   0x6   :  { %14 = vsyncpa [#allocation6], 0 }
   0x7   :  { %16 = vsyncpa [#allocation6 + $0x1], 0  ;;  %s755_s12 = smov 0   ;;  %s757_s13 = smov 0  }
   0x8   :  { %s759_s14 = smov 0   ;;  %s761_s15 = smov 0  }
   0x9   :  { %s763_s16 = smov 0   ;;  %s765_s17 = smov 0  }
   0xa LB: > { %915 = sst [smem:[#allocation14_spill]] %s727_s16  ;;  %s786_s18 = sadd.s32 4294967295, %s731_s17   ;;  %s731_s17 = sphi %s765_s17, %s22_s17   ;;  %s727_s16 = sphi %s763_s16, %s927_s16   ;;  %s723_s15 = sphi %s761_s15, %s926_s15   ;;  %s719_s14 = sphi %s759_s14, %s930_s14   ;;  %s715_s13 = sphi %s757_s13, %s929_s13   ;;  %s711_s12 = sphi %s755_s12, %s928_s12  }
   0xb   : > { %s460_s19 = sadd.s32 4294967294, %s731_s17   ;;  %s34_s20 = sadd.s32 1, %s727_s16 }
   0xc   : > { %s43_s21 = sadd.s32 1, %s719_s14  ;;  %p36_p0 = scmp.ge.s32.totalorder %s34_s20, 2 }
   0xd   : > { %p50_p1 = scmp.ne.s32.totalorder %s719_s14, %s715_s13  ;;  %p51_p2 = scmp.eq.s32.totalorder %s731_s17, 0 }
   0xe   : > { %p56_p3 = scmp.ne.s32.totalorder %s715_s13, %s711_s12  ;;  %s932_s20 = smov (%p36_p0, %s34_s20), 0 }
   0xf   : > { %916 = sst [smem:[#allocation15_spill]] %s932_s20  ;;  %p798_p4 = por %p51_p2, %p50_p1 }
  0x10   : > { %p57_p5 = scmp.eq.s32.totalorder %s786_s18, 0  ;;  %s40_s23 = ssub.s32 %s727_s16, %s932_s20 }
  0x11   : > { %p136_p6 = scmp.eq.s32.totalorder %s786_s18, 1  ;;  %p41_p7 = scmp.eq.s32.totalorder %s40_s23, 0 }
  0x12   : > { %p806_p8 = por %p57_p5, %p56_p3  ;;  %p142_p10 = scmp.eq.s32.totalorder %s460_s19, 1 }
  0x13   : > { %p810_p9 = por %p136_p6, %p50_p1  ;;  %p462_p12 = scmp.ge.s32.totalorder %s731_s17, 2 }
  0x14   : > { %s815_s26 = scalar_select %p41_p7, %s719_s14, %s43_s21  }
  0x15   : > { %p817_p11 = por %p142_p10, %p56_p3  ;;  %p503_p13 = scmp.lt.s32.totalorder %s731_s17, 2 }
  0x16   : > { %920 = sst [smem:[#allocation16_spill]] %s815_s26  ;;  %s162_s28 = sand.u32 1, %s719_s14  }
  0x17   : > { %s463_s29 = sshll.u32 %s162_s28, 3  ;;  %s464_s30 = sshll.u32 %s727_s16, 3 }
  0x18   : > { %p827_p0 = pnand %p503_p13, %p798_p4  ;;  %s182_s5 = sand.u32 1, %s731_s17  }
  0x19   : > { %s923_s1 = sld [smem:[#allocation17_spill]]  ;;  %s186_s10 = scalar_lea.vmem [#allocation7], %s463_s29 }
  0x1a   : > { %s195_s11 = sshll.u32 %s186_s10, 4  ;;  %s183_s19 = scalar_lea.sflag [#allocation8], %s182_s5  ;;  %s196_s11 = int_to_ptr.vmem [resolvable:$true] %s195_s11 }
  0x1b   : > { %p469_p1 = scmp.ge.s32.totalorder %s731_s17, 1  ;;  %p220_p2 = scmp.lt.s32.totalorder %s731_s17, 3 }
  0x1c   : > { %s171_s6 = scalar_lea.hbm %s908_s0, %s464_s30  ;;  %s163_s10 = scalar_lea.sflag [#allocation5], %s162_s28 }
  0x1d   : > { %p839_p3 = pnand %p469_p1, %p220_p2  ;;  %s173_s7 = sshll.u32 %s171_s6, 4  ;;  %s174_s7 = int_to_ptr.hbm [resolvable:$true] %s173_s7 }
  0x1e   : > { %s206_s16 = scalar_lea.vmem [#allocation9], %s463_s29  ;;  %s856_s22 = sand.u32 (!%p839_p3), 1, %s715_s13  }
  0x1f   : > { %s191_s8 = scalar_lea.hbm %s923_s1, %s464_s30  ;;  %s215_s26 = sshll.u32 %s206_s16, 4  ;;  %s216_s26 = int_to_ptr.vmem [resolvable:$true] %s215_s26 }
  0x20   : > { %s193_s9 = sshll.u32 %s191_s8, 4  ;;  %s166_s8 = scalar_lea.vmem [#allocation4], %s463_s29  ;;  %s194_s9 = int_to_ptr.hbm [resolvable:$true] %s193_s9 }
  0x21   : > { %495 = dma.hbm_to_vmem [thread:$0]  (!%p827_p0), %s194_s9, 128, %s196_s11, %s183_s19  }
  0x22   : > { %s175_s1 = sshll.u32 %s166_s8, 4  ;;  %s211_s11 = scalar_lea.hbm %s910_s2, %s464_s30  ;;  %s176_s1 = int_to_ptr.vmem [resolvable:$true] %s175_s1 }
  0x23   : > { %492 = dma.hbm_to_vmem [thread:$0]  (!%p827_p0), %s174_s7, 128, %s176_s1, %s163_s10  }
  0x24   : > { %s213_s20 = sshll.u32 %s211_s11, 4  ;;  %224 = sbr.rel (%p839_p3) target bundleno = 62 (0x3e), region = 32  ;;  %s214_s20 = int_to_ptr.hbm [resolvable:$true] %s213_s20 }
  0x25   : > { %498 = dma.hbm_to_vmem [thread:$0]  (!%p827_p0), %s214_s20, 128, %s216_s26, %s183_s19  }
  0x26   : > { %s470_s1 = sshll.u32 (!%p839_p3), %s856_s22, 3  ;;  %s227_s28 = scalar_lea.sflag (!%p839_p3), [#allocation5], %s856_s22 }
  0x27   : > { %s230_s23 = scalar_lea.vmem (!%p839_p3), [#allocation4], %s470_s1 }
  0x29   : > { %698 = dma.done.wait (%p806_p8), %s227_s28, 128  }
  0x2a   : > { %700 = vsyncadd (%p806_p8), %s227_s28, 4294967168  ;;  %s236_s16 = sand.u32 1, %s786_s18   ;;  %s240_s26 = scalar_lea.vmem [#allocation7], %s470_s1 }
  0x2b   : > { %s237_s20 = scalar_lea.sflag [#allocation8], %s236_s16 }
  0x2c   : > { %702 = dma.done.wait (%p806_p8), %s237_s20, 256  }
  0x2d   : > { %704 = vsyncadd (%p806_p8), %s237_s20, 4294967040  ;;  %s473_s29 = sshll.u32 %s856_s22, 4  ;;  %s480_s30 = sshll.u32 %s723_s15, 4  ;;  %v294_v1 = vld [vmem:[%s230_s23] sm:$0xff]  ;;  %v296_v2 = vld [vmem:[%s240_s26] sm:$0xff] }
  0x2e   : > { %s328_s21 = scalar_lea.hbm %s911_s3, %s480_s30  ;;  %s250_s6 = scalar_lea.vmem [#allocation9], %s470_s1 }
  0x2f   : > { %v293_v0 = vld [vmem:[%s250_s6] sm:$0xff]  ;;  %s283_s18 = scalar_lea.vmem [#allocation10], %s473_s29  ;;  %s331_s24 = sshll.u32 %s328_s21, 4  ;;  %s332_s24 = int_to_ptr.hbm [resolvable:$true] %s331_s24 }
  0x30   : > { %s329_s7 = sshll.u32 %s283_s18, 4  ;;  %v295_v3 = vsub.f32 %v294_v1, %v293_v0  ;;  %v297_v4 = vsub.f32 %v296_v2, %v293_v0  ;;  %s317_s15 = scalar_lea.sflag [#allocation6], %s856_s22  ;;  %s330_s7 = int_to_ptr.vmem [resolvable:$true] %s329_s7 }
  0x31   : > { %s659_s8 = sshra.s32 %s332_s24, 4  ;;  %s665_s11 = scalar_lea.hbm %s911_s3, 32  ;;  %s660_s8 = int_to_ptr.hbm [resolvable:$true] %s659_s8 }
  0x32   : > { %v299_v5 = vmul.f32 %v295_v3, %v295_v3  ;;  %v304_v6 = vand.u32 2147483647, %v297_v4  ;;  %s661_s10 = scalar_lea.hbm %s660_s8, 16  ;;  %p666_p7 = scmp.lt.s32.totalorder %s660_s8, %s911_s3 }
  0x33   : > { %p662_p4 = scmp.ne.s32.totalorder %s660_s8, %s661_s10  ;;  %p667_p8 = scmp.lt.s32.totalorder %s665_s11, %s661_s10 }
  0x34   : > { %312 = vst [vmem:[%s283_s18] sm:$0xff] %v299_v5 }
  0x35   : > { %474 = vst [vmem:[%s283_s18 + $0x8] sm:$0xff] %v304_v6  ;;  %p663_p5 = pnand %p662_p4, %p810_p9  ;;  %p668_p10 = por %p667_p8, %p666_p7 }
  0x37   : > { %p664_p6 = pneg %p663_p5 }
  0x39   : > { %p669_p13 = pnand %p668_p10, %p664_p6 }
  0x3b   : > { %672 = shalt.err (!%p669_p13)
}
  0x3c   : > { %s733_s22 = smov 128   ;;  %s734_s23 = smov 8  }
  0x3d   : > { %487 = dma.vmem_to_hbm [thread:$0]  (%p810_p9), %s330_s7, 256, %s332_s24, %s317_s15, %s733_s22, %s733_s22, %s734_s23  }
  0x3e PF: > { %s346_s16 = sand.u32 1, %s711_s12   ;;  %p500_p0 = pnand %p462_p12, %p817_p11 }
  0x3f   : > { %s347_s20 = scalar_lea.sflag [#allocation6], %s346_s16 }
  0x40   : > { %p501_p1 = pneg %p500_p0 }
  0x42   : > { %706 = dma.done.wait (%p501_p1), %s347_s20, 256  }
  0x43   : > { %708 = vsyncadd (%p501_p1), %s347_s20, 4294967040  ;;  %s22_s17 = sadd.s32 1, %s731_s17   ;;  %s925_s26 = sld [smem:[#allocation16_spill]] }
  0x44   : > { %p19_p2 = scmp.ge.s32.totalorder %s22_s17, 4   ;;  %s926_s15 = sld [smem:[#allocation14_spill]] }
  0x45   : > { %s927_s16 = sld [smem:[#allocation15_spill]]  ;;  %s928_s12 = smov %s715_s13 }
  0x46   : > { %s929_s13 = smov %s719_s14  ;;  %21 = sbr.rel (!%p19_p2) target bundleno = 10 (0xa), region = 110 }
  0x49   : > { %s930_s14 = smov %s925_s26 }
  0x4b   :  { %353 = vsyncpa [#allocation5], 1 }
  0x4c   :  { %355 = vsyncpa [#allocation5 + $0x1], 1 }
  0x4d   :  { %356 = vsyncpa [#allocation8], 1 }
  0x4e   :  { %358 = vsyncpa [#allocation8 + $0x1], 1 }
  0x4f   :  { %359 = vsyncpa [#allocation6], 1 }
  0x50   :  { %361 = vsyncpa [#allocation6 + $0x1], 1 }

</bundles_post_ra>
